<compile_context>
chip_gen: v6e
topology: v6e:2x2x1
jax: 0.10.0
libtpu: 0.0.40
codegen_flags: <defaults>
</compile_context>

<pallas_src>
import jax
import jax.numpy as jnp
from jax.experimental import pallas as pl
from jax.experimental.pallas import tpu as pltpu

HIDDEN_SIZE = 2
INPUT_SIZE = 1
NUM_CLASSES = 1
NUM_LAYERS = 1   # kernel implements the single-layer case (matches module config)
SEQ_LENGTH = 12

# Packed-parameter layout (flat float32, SMEM):
#   [ wih (I,4H) | whh (H,4H) | bias (4H,) | fcw (H,C) | fcb (C,) ]
# with the g-gate (tanh) columns of wih/whh/bias pre-scaled by 2.
G_SIZE = 4 * HIDDEN_SIZE
OFF_WIH = 0
OFF_WHH = OFF_WIH + INPUT_SIZE * G_SIZE
OFF_B = OFF_WHH + HIDDEN_SIZE * G_SIZE
OFF_FCW = OFF_B + G_SIZE
OFF_FCB = OFF_FCW + HIDDEN_SIZE * NUM_CLASSES
NPARAMS = OFF_FCB + NUM_CLASSES


def _lstm_fc_kernel(x_ref, p_ref, out_ref):
    """LSTM recurrence + final FC; gates on sublanes, batch on lanes.

    x_ref:   (T, I, B) VMEM  -- time-major input, batch along the lane axis
    p_ref:   (NPARAMS,) SMEM -- packed parameters (see layout above)
    out_ref: (C, B) VMEM
    """
    T, I, B = x_ref.shape
    H = HIDDEN_SIZE
    G = 4 * H
    C = out_ref.shape[0]

    def row_tile(off, n):
        # (n, B) tile whose row g is the SMEM scalar p_ref[off+g] splatted
        # across lanes (sreg -> vreg splat; built once, outside the t-loop).
        rows = [jnp.full((1, B), p_ref[off + g], dtype=jnp.float32)
                for g in range(n)]
        return rows[0] if n == 1 else jnp.concatenate(rows, axis=0)

    # ---- loop-invariant weight tiles (hoisted out of the recurrence) -------
    bias_tile = row_tile(OFF_B, G)                                   # (G, B)
    wih_tiles = [row_tile(OFF_WIH + i * G, G) for i in range(I)]     # I x (G, B)
    whh_tiles = [row_tile(OFF_WHH + j * G, G) for j in range(H)]     # H x (G, B)

    # ---- hoisted input projection: x_proj[t] = bias + sum_i x[t,i,:]*wih_i -
    x = x_ref[...]                                                   # (T, I, B)
    x_proj = jnp.broadcast_to(bias_tile[None, :, :], (T, G, B))
    for i in range(I):
        x_proj = x_proj + wih_tiles[i][None, :, :] * x[:, i:i + 1, :]  # (T,G,B)

    h = jnp.zeros((H, B), jnp.float32)
    c = jnp.zeros((H, B), jnp.float32)

    # ---- fully unrolled T(=12)-step recurrence (VPU + EUP only) ------------
    # Per step: H sublane-broadcast mul/adds for h @ whh, ONE sigmoid over the
    # full (G, B) gate tile, and one tanh(c).  tanh(g) is recovered from the
    # pre-scaled g columns via 2*sigmoid(2g) - 1.
    for t in range(T):
        gates = x_proj[t]                                            # (G, B)
        for j in range(H):
            gates = gates + whh_tiles[j] * h[j:j + 1, :]             # VPU only
        sig = jax.nn.sigmoid(gates)                                  # 1 EUP pass
        i_g = sig[0 * H:1 * H, :]
        f_g = sig[1 * H:2 * H, :]
        g_g = 2.0 * sig[2 * H:3 * H, :] - 1.0                        # == tanh(g)
        o_g = sig[3 * H:4 * H, :]
        c = f_g * c + i_g * g_g
        h = o_g * jnp.tanh(c)                                        # 1 EUP pass

    # ---- final Linear on last hidden state (sreg scalar x lane vector) -----
    out_rows = []
    for cc in range(C):
        acc = jnp.full((1, B), p_ref[OFF_FCB + cc], dtype=jnp.float32)
        for j in range(H):
            acc = acc + p_ref[OFF_FCW + j * C + cc] * h[j:j + 1, :]
        out_rows.append(acc)
    out_ref[...] = out_rows[0] if C == 1 else jnp.concatenate(out_rows, axis=0)


@jax.jit
def _lstm_forward_impl(x, packed_params):
    """x: (B, T, I) float32 -> (B, NUM_CLASSES) float32."""
    B = x.shape[0]
    # Layout transpose lives in the jitted wrapper, not in the kernel:
    # time-major, batch rides the lane dimension.
    x_tib = jnp.transpose(x, (1, 2, 0))                              # (T, I, B)
    out_cb = pl.pallas_call(
        _lstm_fc_kernel,
        out_shape=jax.ShapeDtypeStruct((NUM_CLASSES, B), jnp.float32),
        in_specs=[
            pl.BlockSpec(memory_space=pltpu.MemorySpace.VMEM),   # x
            pl.BlockSpec(memory_space=pltpu.MemorySpace.SMEM),   # packed params
        ],
        out_specs=pl.BlockSpec(memory_space=pltpu.MemorySpace.VMEM),
    )(x_tib, packed_params)
    return jnp.transpose(out_cb)                                     # (B, C)


def lstm_forward(x, packed_params):
    return _lstm_forward_impl(x, packed_params)


def init_params(key):
    """Deterministic init matching PyTorch LSTM/Linear parameter shapes.

    Returns:
      packed:     flat float32 (NPARAMS,) kernel params, with the g-gate
                  columns of wih/whh/bias pre-scaled by 2 (sigmoid identity),
      ref_params: unscaled (wih, whh, bias, fcw, fcb) for the pure-JAX
                  reference of the original PyTorch semantics.
    """
    k = jax.random.split(key, 6)
    bound = 1.0 / (HIDDEN_SIZE ** 0.5)
    u = lambda kk, shape: jax.random.uniform(
        kk, shape, jnp.float32, minval=-bound, maxval=bound)

    # PyTorch shapes: weight_ih_l0 (4H, I), weight_hh_l0 (4H, H),
    # bias_ih_l0 / bias_hh_l0 (4H,), fc.weight (C, H), fc.bias (C,).
    w_ih = u(k[0], (4 * HIDDEN_SIZE, INPUT_SIZE))
    w_hh = u(k[1], (4 * HIDDEN_SIZE, HIDDEN_SIZE))
    b_ih = u(k[2], (4 * HIDDEN_SIZE,))
    b_hh = u(k[3], (4 * HIDDEN_SIZE,))
    fc_w = u(k[4], (NUM_CLASSES, HIDDEN_SIZE))
    fc_b = u(k[5], (NUM_CLASSES,))

    wih = jnp.transpose(w_ih)        # (I, 4H)
    whh = jnp.transpose(w_hh)        # (H, 4H)
    bias = b_ih + b_hh               # (4H,)
    fcw = jnp.transpose(fc_w)        # (H, C)
    fcb = fc_b                       # (C,)
    ref_params = (wih, whh, bias, fcw, fcb)

    # Pre-scale ONLY the g-gate (tanh) columns by 2: tanh(z) = 2*sigmoid(2z)-1.
    H = HIDDEN_SIZE
    g_sl = slice(2 * H, 3 * H)
    wih_s = wih.at[:, g_sl].multiply(2.0)
    whh_s = whh.at[:, g_sl].multiply(2.0)
    bias_s = bias.at[g_sl].multiply(2.0)

    packed = jnp.concatenate([
        wih_s.ravel(), whh_s.ravel(), bias_s.ravel(), fcw.ravel(), fcb.ravel()
    ]).astype(jnp.float32)
    assert packed.shape == (NPARAMS,)
    return packed, ref_params


def reference_forward(x, ref_params):
    """Pure-JAX reference of the PyTorch module's forward (unscaled params)."""
    wih, whh, bias, fcw, fcb = ref_params
    B, T, _ = x.shape
    H = HIDDEN_SIZE
    h = jnp.zeros((B, H), jnp.float32)
    c = jnp.zeros((B, H), jnp.float32)
    for t in range(T):
        gates = x[:, t, :] @ wih + h @ whh + bias[None, :]
        i_g = jax.nn.sigmoid(gates[:, 0 * H:1 * H])
        f_g = jax.nn.sigmoid(gates[:, 1 * H:2 * H])
        g_g = jnp.tanh(gates[:, 2 * H:3 * H])
        o_g = jax.nn.sigmoid(gates[:, 3 * H:4 * H])
        c = f_g * c + i_g * g_g
        h = o_g * jnp.tanh(c)
    return h @ fcw + fcb[None, :]


if __name__ == "__main__":
    key = jax.random.PRNGKey(0)
    pkey, xkey = jax.random.split(key)

    packed_params, ref_params = init_params(pkey)

    batch = 2
    x = jax.random.normal(xkey, (batch, SEQ_LENGTH, INPUT_SIZE), jnp.float32)

    out = lstm_forward(x, packed_params)
    out = jax.block_until_ready(out)

    ref = reference_forward(x, ref_params)
    assert out.shape == (batch, NUM_CLASSES)
    # atol 1e-4: the tanh-via-sigmoid identity + EUP approximations introduce
    # ~1e-6-level absolute differences over the 12-step recurrence.
    assert jnp.allclose(out, ref, atol=1e-4, rtol=1e-4), (out, ref)

    print("KERNEL_OK")
</pallas_src>

<mosaic_0001>
module attributes {stable_mosaic.version = 11 : i64} {
  func.func @_lstm_fc_kernel(%arg0: memref<12x1x2xf32, #tpu.memory_space<vmem>>, %arg1: memref<35xf32, #tpu.memory_space<smem>>, %arg2: memref<1x2xf32, #tpu.memory_space<vmem>>) attributes {dimension_semantics = [], scalar_prefetch = 0 : i64, scratch_operands = 0 : i64, tpu.core_type = #tpu.core_type<tc>} {
    %c24 = arith.constant 24 : index
    %0 = memref.load %arg1[%c24] : memref<35xf32, #tpu.memory_space<smem>>
    %1 = vector.broadcast %0 : f32 to vector<1x2xf32>
    %c25 = arith.constant 25 : index
    %2 = memref.load %arg1[%c25] : memref<35xf32, #tpu.memory_space<smem>>
    %3 = vector.broadcast %2 : f32 to vector<1x2xf32>
    %c26 = arith.constant 26 : index
    %4 = memref.load %arg1[%c26] : memref<35xf32, #tpu.memory_space<smem>>
    %5 = vector.broadcast %4 : f32 to vector<1x2xf32>
    %c27 = arith.constant 27 : index
    %6 = memref.load %arg1[%c27] : memref<35xf32, #tpu.memory_space<smem>>
    %7 = vector.broadcast %6 : f32 to vector<1x2xf32>
    %c28 = arith.constant 28 : index
    %8 = memref.load %arg1[%c28] : memref<35xf32, #tpu.memory_space<smem>>
    %9 = vector.broadcast %8 : f32 to vector<1x2xf32>
    %c29 = arith.constant 29 : index
    %10 = memref.load %arg1[%c29] : memref<35xf32, #tpu.memory_space<smem>>
    %11 = vector.broadcast %10 : f32 to vector<1x2xf32>
    %c30 = arith.constant 30 : index
    %12 = memref.load %arg1[%c30] : memref<35xf32, #tpu.memory_space<smem>>
    %13 = vector.broadcast %12 : f32 to vector<1x2xf32>
    %c31 = arith.constant 31 : index
    %14 = memref.load %arg1[%c31] : memref<35xf32, #tpu.memory_space<smem>>
    %15 = vector.broadcast %14 : f32 to vector<1x2xf32>
    %16 = tpu.concatenate %1, %3, %5, %7, %9, %11, %13, %15 in 0 : vector<1x2xf32>, vector<1x2xf32>, vector<1x2xf32>, vector<1x2xf32>, vector<1x2xf32>, vector<1x2xf32>, vector<1x2xf32>, vector<1x2xf32> -> vector<8x2xf32>
    %c0 = arith.constant 0 : index
    %17 = memref.load %arg1[%c0] : memref<35xf32, #tpu.memory_space<smem>>
    %18 = vector.broadcast %17 : f32 to vector<1x2xf32>
    %c1 = arith.constant 1 : index
    %19 = memref.load %arg1[%c1] : memref<35xf32, #tpu.memory_space<smem>>
    %20 = vector.broadcast %19 : f32 to vector<1x2xf32>
    %c2 = arith.constant 2 : index
    %21 = memref.load %arg1[%c2] : memref<35xf32, #tpu.memory_space<smem>>
    %22 = vector.broadcast %21 : f32 to vector<1x2xf32>
    %c3 = arith.constant 3 : index
    %23 = memref.load %arg1[%c3] : memref<35xf32, #tpu.memory_space<smem>>
    %24 = vector.broadcast %23 : f32 to vector<1x2xf32>
    %c4 = arith.constant 4 : index
    %25 = memref.load %arg1[%c4] : memref<35xf32, #tpu.memory_space<smem>>
    %26 = vector.broadcast %25 : f32 to vector<1x2xf32>
    %c5 = arith.constant 5 : index
    %27 = memref.load %arg1[%c5] : memref<35xf32, #tpu.memory_space<smem>>
    %28 = vector.broadcast %27 : f32 to vector<1x2xf32>
    %c6 = arith.constant 6 : index
    %29 = memref.load %arg1[%c6] : memref<35xf32, #tpu.memory_space<smem>>
    %30 = vector.broadcast %29 : f32 to vector<1x2xf32>
    %c7 = arith.constant 7 : index
    %31 = memref.load %arg1[%c7] : memref<35xf32, #tpu.memory_space<smem>>
    %32 = vector.broadcast %31 : f32 to vector<1x2xf32>
    %33 = tpu.concatenate %18, %20, %22, %24, %26, %28, %30, %32 in 0 : vector<1x2xf32>, vector<1x2xf32>, vector<1x2xf32>, vector<1x2xf32>, vector<1x2xf32>, vector<1x2xf32>, vector<1x2xf32>, vector<1x2xf32> -> vector<8x2xf32>
    %c8 = arith.constant 8 : index
    %34 = memref.load %arg1[%c8] : memref<35xf32, #tpu.memory_space<smem>>
    %35 = vector.broadcast %34 : f32 to vector<1x2xf32>
    %c9 = arith.constant 9 : index
    %36 = memref.load %arg1[%c9] : memref<35xf32, #tpu.memory_space<smem>>
    %37 = vector.broadcast %36 : f32 to vector<1x2xf32>
    %c10 = arith.constant 10 : index
    %38 = memref.load %arg1[%c10] : memref<35xf32, #tpu.memory_space<smem>>
    %39 = vector.broadcast %38 : f32 to vector<1x2xf32>
    %c11 = arith.constant 11 : index
    %40 = memref.load %arg1[%c11] : memref<35xf32, #tpu.memory_space<smem>>
    %41 = vector.broadcast %40 : f32 to vector<1x2xf32>
    %c12 = arith.constant 12 : index
    %42 = memref.load %arg1[%c12] : memref<35xf32, #tpu.memory_space<smem>>
    %43 = vector.broadcast %42 : f32 to vector<1x2xf32>
    %c13 = arith.constant 13 : index
    %44 = memref.load %arg1[%c13] : memref<35xf32, #tpu.memory_space<smem>>
    %45 = vector.broadcast %44 : f32 to vector<1x2xf32>
    %c14 = arith.constant 14 : index
    %46 = memref.load %arg1[%c14] : memref<35xf32, #tpu.memory_space<smem>>
    %47 = vector.broadcast %46 : f32 to vector<1x2xf32>
    %c15 = arith.constant 15 : index
    %48 = memref.load %arg1[%c15] : memref<35xf32, #tpu.memory_space<smem>>
    %49 = vector.broadcast %48 : f32 to vector<1x2xf32>
    %50 = tpu.concatenate %35, %37, %39, %41, %43, %45, %47, %49 in 0 : vector<1x2xf32>, vector<1x2xf32>, vector<1x2xf32>, vector<1x2xf32>, vector<1x2xf32>, vector<1x2xf32>, vector<1x2xf32>, vector<1x2xf32> -> vector<8x2xf32>
    %c16 = arith.constant 16 : index
    %51 = memref.load %arg1[%c16] : memref<35xf32, #tpu.memory_space<smem>>
    %52 = vector.broadcast %51 : f32 to vector<1x2xf32>
    %c17 = arith.constant 17 : index
    %53 = memref.load %arg1[%c17] : memref<35xf32, #tpu.memory_space<smem>>
    %54 = vector.broadcast %53 : f32 to vector<1x2xf32>
    %c18 = arith.constant 18 : index
    %55 = memref.load %arg1[%c18] : memref<35xf32, #tpu.memory_space<smem>>
    %56 = vector.broadcast %55 : f32 to vector<1x2xf32>
    %c19 = arith.constant 19 : index
    %57 = memref.load %arg1[%c19] : memref<35xf32, #tpu.memory_space<smem>>
    %58 = vector.broadcast %57 : f32 to vector<1x2xf32>
    %c20 = arith.constant 20 : index
    %59 = memref.load %arg1[%c20] : memref<35xf32, #tpu.memory_space<smem>>
    %60 = vector.broadcast %59 : f32 to vector<1x2xf32>
    %c21 = arith.constant 21 : index
    %61 = memref.load %arg1[%c21] : memref<35xf32, #tpu.memory_space<smem>>
    %62 = vector.broadcast %61 : f32 to vector<1x2xf32>
    %c22 = arith.constant 22 : index
    %63 = memref.load %arg1[%c22] : memref<35xf32, #tpu.memory_space<smem>>
    %64 = vector.broadcast %63 : f32 to vector<1x2xf32>
    %c23 = arith.constant 23 : index
    %65 = memref.load %arg1[%c23] : memref<35xf32, #tpu.memory_space<smem>>
    %66 = vector.broadcast %65 : f32 to vector<1x2xf32>
    %67 = tpu.concatenate %52, %54, %56, %58, %60, %62, %64, %66 in 0 : vector<1x2xf32>, vector<1x2xf32>, vector<1x2xf32>, vector<1x2xf32>, vector<1x2xf32>, vector<1x2xf32>, vector<1x2xf32>, vector<1x2xf32> -> vector<8x2xf32>
    %c0_0 = arith.constant 0 : index
    %c0_1 = arith.constant 0 : index
    %c0_2 = arith.constant 0 : index
    %68 = vector.load %arg0[%c0_0, %c0_1, %c0_2] : memref<12x1x2xf32, #tpu.memory_space<vmem>>, vector<12x1x2xf32>
    %69 = vector.shape_cast %16 : vector<8x2xf32> to vector<1x8x2xf32>
    %70 = vector.shape_cast %69 : vector<1x8x2xf32> to vector<1x8x2xf32>
    %71 = vector.broadcast %70 : vector<1x8x2xf32> to vector<12x8x2xf32>
    %72 = vector.shape_cast %33 : vector<8x2xf32> to vector<1x8x2xf32>
    %73 = vector.broadcast %72 : vector<1x8x2xf32> to vector<12x8x2xf32>
    %74 = vector.broadcast %68 : vector<12x1x2xf32> to vector<12x8x2xf32>
    %75 = arith.mulf %73, %74 : vector<12x8x2xf32>
    %76 = arith.addf %71, %75 : vector<12x8x2xf32>
    %cst = arith.constant 0.000000e+00 : f32
    %77 = vector.broadcast %cst : f32 to vector<2x2xf32>
    %cst_3 = arith.constant 0.000000e+00 : f32
    %78 = vector.broadcast %cst_3 : f32 to vector<2x2xf32>
    %79 = vector.extract_strided_slice %76 {offsets = [0, 0, 0], sizes = [1, 8, 2], strides = [1, 1, 1]} : vector<12x8x2xf32> to vector<1x8x2xf32>
    %80 = vector.shape_cast %79 : vector<1x8x2xf32> to vector<8x2xf32>
    %81 = vector.extract_strided_slice %77 {offsets = [0, 0], sizes = [1, 2], strides = [1, 1]} : vector<2x2xf32> to vector<1x2xf32>
    %82 = vector.broadcast %81 : vector<1x2xf32> to vector<8x2xf32>
    %83 = arith.mulf %50, %82 : vector<8x2xf32>
    %84 = arith.addf %80, %83 : vector<8x2xf32>
    %85 = vector.extract_strided_slice %77 {offsets = [1, 0], sizes = [1, 2], strides = [1, 1]} : vector<2x2xf32> to vector<1x2xf32>
    %86 = vector.broadcast %85 : vector<1x2xf32> to vector<8x2xf32>
    %87 = arith.mulf %67, %86 : vector<8x2xf32>
    %88 = arith.addf %84, %87 : vector<8x2xf32>
    %89 = arith.negf %88 : vector<8x2xf32>
    %90 = math.exp %89 : vector<8x2xf32>
    %cst_4 = arith.constant 1.000000e+00 : f32
    %91 = vector.broadcast %cst_4 : f32 to vector<8x2xf32>
    %92 = arith.addf %91, %90 : vector<8x2xf32>
    %93 = arith.divf %91, %92 : vector<8x2xf32>
    %94 = vector.extract_strided_slice %93 {offsets = [0, 0], sizes = [2, 2], strides = [1, 1]} : vector<8x2xf32> to vector<2x2xf32>
    %95 = vector.extract_strided_slice %93 {offsets = [2, 0], sizes = [2, 2], strides = [1, 1]} : vector<8x2xf32> to vector<2x2xf32>
    %96 = vector.extract_strided_slice %93 {offsets = [4, 0], sizes = [2, 2], strides = [1, 1]} : vector<8x2xf32> to vector<2x2xf32>
    %cst_5 = arith.constant 2.000000e+00 : f32
    %97 = vector.broadcast %cst_5 : f32 to vector<2x2xf32>
    %98 = arith.mulf %97, %96 : vector<2x2xf32>
    %cst_6 = arith.constant 1.000000e+00 : f32
    %99 = vector.broadcast %cst_6 : f32 to vector<2x2xf32>
    %100 = arith.subf %98, %99 : vector<2x2xf32>
    %101 = vector.extract_strided_slice %93 {offsets = [6, 0], sizes = [2, 2], strides = [1, 1]} : vector<8x2xf32> to vector<2x2xf32>
    %102 = arith.mulf %95, %78 : vector<2x2xf32>
    %103 = arith.mulf %94, %100 : vector<2x2xf32>
    %104 = arith.addf %102, %103 : vector<2x2xf32>
    %105 = math.tanh %104 : vector<2x2xf32>
    %106 = arith.mulf %101, %105 : vector<2x2xf32>
    %107 = vector.extract_strided_slice %76 {offsets = [1, 0, 0], sizes = [1, 8, 2], strides = [1, 1, 1]} : vector<12x8x2xf32> to vector<1x8x2xf32>
    %108 = vector.shape_cast %107 : vector<1x8x2xf32> to vector<8x2xf32>
    %109 = vector.extract_strided_slice %106 {offsets = [0, 0], sizes = [1, 2], strides = [1, 1]} : vector<2x2xf32> to vector<1x2xf32>
    %110 = vector.broadcast %109 : vector<1x2xf32> to vector<8x2xf32>
    %111 = arith.mulf %50, %110 : vector<8x2xf32>
    %112 = arith.addf %108, %111 : vector<8x2xf32>
    %113 = vector.extract_strided_slice %106 {offsets = [1, 0], sizes = [1, 2], strides = [1, 1]} : vector<2x2xf32> to vector<1x2xf32>
    %114 = vector.broadcast %113 : vector<1x2xf32> to vector<8x2xf32>
    %115 = arith.mulf %67, %114 : vector<8x2xf32>
    %116 = arith.addf %112, %115 : vector<8x2xf32>
    %117 = arith.negf %116 : vector<8x2xf32>
    %118 = math.exp %117 : vector<8x2xf32>
    %cst_7 = arith.constant 1.000000e+00 : f32
    %119 = vector.broadcast %cst_7 : f32 to vector<8x2xf32>
    %120 = arith.addf %119, %118 : vector<8x2xf32>
    %121 = arith.divf %119, %120 : vector<8x2xf32>
    %122 = vector.extract_strided_slice %121 {offsets = [0, 0], sizes = [2, 2], strides = [1, 1]} : vector<8x2xf32> to vector<2x2xf32>
    %123 = vector.extract_strided_slice %121 {offsets = [2, 0], sizes = [2, 2], strides = [1, 1]} : vector<8x2xf32> to vector<2x2xf32>
    %124 = vector.extract_strided_slice %121 {offsets = [4, 0], sizes = [2, 2], strides = [1, 1]} : vector<8x2xf32> to vector<2x2xf32>
    %cst_8 = arith.constant 2.000000e+00 : f32
    %125 = vector.broadcast %cst_8 : f32 to vector<2x2xf32>
    %126 = arith.mulf %125, %124 : vector<2x2xf32>
    %cst_9 = arith.constant 1.000000e+00 : f32
    %127 = vector.broadcast %cst_9 : f32 to vector<2x2xf32>
    %128 = arith.subf %126, %127 : vector<2x2xf32>
    %129 = vector.extract_strided_slice %121 {offsets = [6, 0], sizes = [2, 2], strides = [1, 1]} : vector<8x2xf32> to vector<2x2xf32>
    %130 = arith.mulf %123, %104 : vector<2x2xf32>
    %131 = arith.mulf %122, %128 : vector<2x2xf32>
    %132 = arith.addf %130, %131 : vector<2x2xf32>
    %133 = math.tanh %132 : vector<2x2xf32>
    %134 = arith.mulf %129, %133 : vector<2x2xf32>
    %135 = vector.extract_strided_slice %76 {offsets = [2, 0, 0], sizes = [1, 8, 2], strides = [1, 1, 1]} : vector<12x8x2xf32> to vector<1x8x2xf32>
    %136 = vector.shape_cast %135 : vector<1x8x2xf32> to vector<8x2xf32>
    %137 = vector.extract_strided_slice %134 {offsets = [0, 0], sizes = [1, 2], strides = [1, 1]} : vector<2x2xf32> to vector<1x2xf32>
    %138 = vector.broadcast %137 : vector<1x2xf32> to vector<8x2xf32>
    %139 = arith.mulf %50, %138 : vector<8x2xf32>
    %140 = arith.addf %136, %139 : vector<8x2xf32>
    %141 = vector.extract_strided_slice %134 {offsets = [1, 0], sizes = [1, 2], strides = [1, 1]} : vector<2x2xf32> to vector<1x2xf32>
    %142 = vector.broadcast %141 : vector<1x2xf32> to vector<8x2xf32>
    %143 = arith.mulf %67, %142 : vector<8x2xf32>
    %144 = arith.addf %140, %143 : vector<8x2xf32>
    %145 = arith.negf %144 : vector<8x2xf32>
    %146 = math.exp %145 : vector<8x2xf32>
    %cst_10 = arith.constant 1.000000e+00 : f32
    %147 = vector.broadcast %cst_10 : f32 to vector<8x2xf32>
    %148 = arith.addf %147, %146 : vector<8x2xf32>
    %149 = arith.divf %147, %148 : vector<8x2xf32>
    %150 = vector.extract_strided_slice %149 {offsets = [0, 0], sizes = [2, 2], strides = [1, 1]} : vector<8x2xf32> to vector<2x2xf32>
    %151 = vector.extract_strided_slice %149 {offsets = [2, 0], sizes = [2, 2], strides = [1, 1]} : vector<8x2xf32> to vector<2x2xf32>
    %152 = vector.extract_strided_slice %149 {offsets = [4, 0], sizes = [2, 2], strides = [1, 1]} : vector<8x2xf32> to vector<2x2xf32>
    %cst_11 = arith.constant 2.000000e+00 : f32
    %153 = vector.broadcast %cst_11 : f32 to vector<2x2xf32>
    %154 = arith.mulf %153, %152 : vector<2x2xf32>
    %cst_12 = arith.constant 1.000000e+00 : f32
    %155 = vector.broadcast %cst_12 : f32 to vector<2x2xf32>
    %156 = arith.subf %154, %155 : vector<2x2xf32>
    %157 = vector.extract_strided_slice %149 {offsets = [6, 0], sizes = [2, 2], strides = [1, 1]} : vector<8x2xf32> to vector<2x2xf32>
    %158 = arith.mulf %151, %132 : vector<2x2xf32>
    %159 = arith.mulf %150, %156 : vector<2x2xf32>
    %160 = arith.addf %158, %159 : vector<2x2xf32>
    %161 = math.tanh %160 : vector<2x2xf32>
    %162 = arith.mulf %157, %161 : vector<2x2xf32>
    %163 = vector.extract_strided_slice %76 {offsets = [3, 0, 0], sizes = [1, 8, 2], strides = [1, 1, 1]} : vector<12x8x2xf32> to vector<1x8x2xf32>
    %164 = vector.shape_cast %163 : vector<1x8x2xf32> to vector<8x2xf32>
    %165 = vector.extract_strided_slice %162 {offsets = [0, 0], sizes = [1, 2], strides = [1, 1]} : vector<2x2xf32> to vector<1x2xf32>
    %166 = vector.broadcast %165 : vector<1x2xf32> to vector<8x2xf32>
    %167 = arith.mulf %50, %166 : vector<8x2xf32>
    %168 = arith.addf %164, %167 : vector<8x2xf32>
    %169 = vector.extract_strided_slice %162 {offsets = [1, 0], sizes = [1, 2], strides = [1, 1]} : vector<2x2xf32> to vector<1x2xf32>
    %170 = vector.broadcast %169 : vector<1x2xf32> to vector<8x2xf32>
    %171 = arith.mulf %67, %170 : vector<8x2xf32>
    %172 = arith.addf %168, %171 : vector<8x2xf32>
    %173 = arith.negf %172 : vector<8x2xf32>
    %174 = math.exp %173 : vector<8x2xf32>
    %cst_13 = arith.constant 1.000000e+00 : f32
    %175 = vector.broadcast %cst_13 : f32 to vector<8x2xf32>
    %176 = arith.addf %175, %174 : vector<8x2xf32>
    %177 = arith.divf %175, %176 : vector<8x2xf32>
    %178 = vector.extract_strided_slice %177 {offsets = [0, 0], sizes = [2, 2], strides = [1, 1]} : vector<8x2xf32> to vector<2x2xf32>
    %179 = vector.extract_strided_slice %177 {offsets = [2, 0], sizes = [2, 2], strides = [1, 1]} : vector<8x2xf32> to vector<2x2xf32>
    %180 = vector.extract_strided_slice %177 {offsets = [4, 0], sizes = [2, 2], strides = [1, 1]} : vector<8x2xf32> to vector<2x2xf32>
    %cst_14 = arith.constant 2.000000e+00 : f32
    %181 = vector.broadcast %cst_14 : f32 to vector<2x2xf32>
    %182 = arith.mulf %181, %180 : vector<2x2xf32>
    %cst_15 = arith.constant 1.000000e+00 : f32
    %183 = vector.broadcast %cst_15 : f32 to vector<2x2xf32>
    %184 = arith.subf %182, %183 : vector<2x2xf32>
    %185 = vector.extract_strided_slice %177 {offsets = [6, 0], sizes = [2, 2], strides = [1, 1]} : vector<8x2xf32> to vector<2x2xf32>
    %186 = arith.mulf %179, %160 : vector<2x2xf32>
    %187 = arith.mulf %178, %184 : vector<2x2xf32>
    %188 = arith.addf %186, %187 : vector<2x2xf32>
    %189 = math.tanh %188 : vector<2x2xf32>
    %190 = arith.mulf %185, %189 : vector<2x2xf32>
    %191 = vector.extract_strided_slice %76 {offsets = [4, 0, 0], sizes = [1, 8, 2], strides = [1, 1, 1]} : vector<12x8x2xf32> to vector<1x8x2xf32>
    %192 = vector.shape_cast %191 : vector<1x8x2xf32> to vector<8x2xf32>
    %193 = vector.extract_strided_slice %190 {offsets = [0, 0], sizes = [1, 2], strides = [1, 1]} : vector<2x2xf32> to vector<1x2xf32>
    %194 = vector.broadcast %193 : vector<1x2xf32> to vector<8x2xf32>
    %195 = arith.mulf %50, %194 : vector<8x2xf32>
    %196 = arith.addf %192, %195 : vector<8x2xf32>
    %197 = vector.extract_strided_slice %190 {offsets = [1, 0], sizes = [1, 2], strides = [1, 1]} : vector<2x2xf32> to vector<1x2xf32>
    %198 = vector.broadcast %197 : vector<1x2xf32> to vector<8x2xf32>
    %199 = arith.mulf %67, %198 : vector<8x2xf32>
    %200 = arith.addf %196, %199 : vector<8x2xf32>
    %201 = arith.negf %200 : vector<8x2xf32>
    %202 = math.exp %201 : vector<8x2xf32>
    %cst_16 = arith.constant 1.000000e+00 : f32
    %203 = vector.broadcast %cst_16 : f32 to vector<8x2xf32>
    %204 = arith.addf %203, %202 : vector<8x2xf32>
    %205 = arith.divf %203, %204 : vector<8x2xf32>
    %206 = vector.extract_strided_slice %205 {offsets = [0, 0], sizes = [2, 2], strides = [1, 1]} : vector<8x2xf32> to vector<2x2xf32>
    %207 = vector.extract_strided_slice %205 {offsets = [2, 0], sizes = [2, 2], strides = [1, 1]} : vector<8x2xf32> to vector<2x2xf32>
    %208 = vector.extract_strided_slice %205 {offsets = [4, 0], sizes = [2, 2], strides = [1, 1]} : vector<8x2xf32> to vector<2x2xf32>
    %cst_17 = arith.constant 2.000000e+00 : f32
    %209 = vector.broadcast %cst_17 : f32 to vector<2x2xf32>
    %210 = arith.mulf %209, %208 : vector<2x2xf32>
    %cst_18 = arith.constant 1.000000e+00 : f32
    %211 = vector.broadcast %cst_18 : f32 to vector<2x2xf32>
    %212 = arith.subf %210, %211 : vector<2x2xf32>
    %213 = vector.extract_strided_slice %205 {offsets = [6, 0], sizes = [2, 2], strides = [1, 1]} : vector<8x2xf32> to vector<2x2xf32>
    %214 = arith.mulf %207, %188 : vector<2x2xf32>
    %215 = arith.mulf %206, %212 : vector<2x2xf32>
    %216 = arith.addf %214, %215 : vector<2x2xf32>
    %217 = math.tanh %216 : vector<2x2xf32>
    %218 = arith.mulf %213, %217 : vector<2x2xf32>
    %219 = vector.extract_strided_slice %76 {offsets = [5, 0, 0], sizes = [1, 8, 2], strides = [1, 1, 1]} : vector<12x8x2xf32> to vector<1x8x2xf32>
    %220 = vector.shape_cast %219 : vector<1x8x2xf32> to vector<8x2xf32>
    %221 = vector.extract_strided_slice %218 {offsets = [0, 0], sizes = [1, 2], strides = [1, 1]} : vector<2x2xf32> to vector<1x2xf32>
    %222 = vector.broadcast %221 : vector<1x2xf32> to vector<8x2xf32>
    %223 = arith.mulf %50, %222 : vector<8x2xf32>
    %224 = arith.addf %220, %223 : vector<8x2xf32>
    %225 = vector.extract_strided_slice %218 {offsets = [1, 0], sizes = [1, 2], strides = [1, 1]} : vector<2x2xf32> to vector<1x2xf32>
    %226 = vector.broadcast %225 : vector<1x2xf32> to vector<8x2xf32>
    %227 = arith.mulf %67, %226 : vector<8x2xf32>
    %228 = arith.addf %224, %227 : vector<8x2xf32>
    %229 = arith.negf %228 : vector<8x2xf32>
    %230 = math.exp %229 : vector<8x2xf32>
    %cst_19 = arith.constant 1.000000e+00 : f32
    %231 = vector.broadcast %cst_19 : f32 to vector<8x2xf32>
    %232 = arith.addf %231, %230 : vector<8x2xf32>
    %233 = arith.divf %231, %232 : vector<8x2xf32>
    %234 = vector.extract_strided_slice %233 {offsets = [0, 0], sizes = [2, 2], strides = [1, 1]} : vector<8x2xf32> to vector<2x2xf32>
    %235 = vector.extract_strided_slice %233 {offsets = [2, 0], sizes = [2, 2], strides = [1, 1]} : vector<8x2xf32> to vector<2x2xf32>
    %236 = vector.extract_strided_slice %233 {offsets = [4, 0], sizes = [2, 2], strides = [1, 1]} : vector<8x2xf32> to vector<2x2xf32>
    %cst_20 = arith.constant 2.000000e+00 : f32
    %237 = vector.broadcast %cst_20 : f32 to vector<2x2xf32>
    %238 = arith.mulf %237, %236 : vector<2x2xf32>
    %cst_21 = arith.constant 1.000000e+00 : f32
    %239 = vector.broadcast %cst_21 : f32 to vector<2x2xf32>
    %240 = arith.subf %238, %239 : vector<2x2xf32>
    %241 = vector.extract_strided_slice %233 {offsets = [6, 0], sizes = [2, 2], strides = [1, 1]} : vector<8x2xf32> to vector<2x2xf32>
    %242 = arith.mulf %235, %216 : vector<2x2xf32>
    %243 = arith.mulf %234, %240 : vector<2x2xf32>
    %244 = arith.addf %242, %243 : vector<2x2xf32>
    %245 = math.tanh %244 : vector<2x2xf32>
    %246 = arith.mulf %241, %245 : vector<2x2xf32>
    %247 = vector.extract_strided_slice %76 {offsets = [6, 0, 0], sizes = [1, 8, 2], strides = [1, 1, 1]} : vector<12x8x2xf32> to vector<1x8x2xf32>
    %248 = vector.shape_cast %247 : vector<1x8x2xf32> to vector<8x2xf32>
    %249 = vector.extract_strided_slice %246 {offsets = [0, 0], sizes = [1, 2], strides = [1, 1]} : vector<2x2xf32> to vector<1x2xf32>
    %250 = vector.broadcast %249 : vector<1x2xf32> to vector<8x2xf32>
    %251 = arith.mulf %50, %250 : vector<8x2xf32>
    %252 = arith.addf %248, %251 : vector<8x2xf32>
    %253 = vector.extract_strided_slice %246 {offsets = [1, 0], sizes = [1, 2], strides = [1, 1]} : vector<2x2xf32> to vector<1x2xf32>
    %254 = vector.broadcast %253 : vector<1x2xf32> to vector<8x2xf32>
    %255 = arith.mulf %67, %254 : vector<8x2xf32>
    %256 = arith.addf %252, %255 : vector<8x2xf32>
    %257 = arith.negf %256 : vector<8x2xf32>
    %258 = math.exp %257 : vector<8x2xf32>
    %cst_22 = arith.constant 1.000000e+00 : f32
    %259 = vector.broadcast %cst_22 : f32 to vector<8x2xf32>
    %260 = arith.addf %259, %258 : vector<8x2xf32>
    %261 = arith.divf %259, %260 : vector<8x2xf32>
    %262 = vector.extract_strided_slice %261 {offsets = [0, 0], sizes = [2, 2], strides = [1, 1]} : vector<8x2xf32> to vector<2x2xf32>
    %263 = vector.extract_strided_slice %261 {offsets = [2, 0], sizes = [2, 2], strides = [1, 1]} : vector<8x2xf32> to vector<2x2xf32>
    %264 = vector.extract_strided_slice %261 {offsets = [4, 0], sizes = [2, 2], strides = [1, 1]} : vector<8x2xf32> to vector<2x2xf32>
    %cst_23 = arith.constant 2.000000e+00 : f32
    %265 = vector.broadcast %cst_23 : f32 to vector<2x2xf32>
    %266 = arith.mulf %265, %264 : vector<2x2xf32>
    %cst_24 = arith.constant 1.000000e+00 : f32
    %267 = vector.broadcast %cst_24 : f32 to vector<2x2xf32>
    %268 = arith.subf %266, %267 : vector<2x2xf32>
    %269 = vector.extract_strided_slice %261 {offsets = [6, 0], sizes = [2, 2], strides = [1, 1]} : vector<8x2xf32> to vector<2x2xf32>
    %270 = arith.mulf %263, %244 : vector<2x2xf32>
    %271 = arith.mulf %262, %268 : vector<2x2xf32>
    %272 = arith.addf %270, %271 : vector<2x2xf32>
    %273 = math.tanh %272 : vector<2x2xf32>
    %274 = arith.mulf %269, %273 : vector<2x2xf32>
    %275 = vector.extract_strided_slice %76 {offsets = [7, 0, 0], sizes = [1, 8, 2], strides = [1, 1, 1]} : vector<12x8x2xf32> to vector<1x8x2xf32>
    %276 = vector.shape_cast %275 : vector<1x8x2xf32> to vector<8x2xf32>
    %277 = vector.extract_strided_slice %274 {offsets = [0, 0], sizes = [1, 2], strides = [1, 1]} : vector<2x2xf32> to vector<1x2xf32>
    %278 = vector.broadcast %277 : vector<1x2xf32> to vector<8x2xf32>
    %279 = arith.mulf %50, %278 : vector<8x2xf32>
    %280 = arith.addf %276, %279 : vector<8x2xf32>
    %281 = vector.extract_strided_slice %274 {offsets = [1, 0], sizes = [1, 2], strides = [1, 1]} : vector<2x2xf32> to vector<1x2xf32>
    %282 = vector.broadcast %281 : vector<1x2xf32> to vector<8x2xf32>
    %283 = arith.mulf %67, %282 : vector<8x2xf32>
    %284 = arith.addf %280, %283 : vector<8x2xf32>
    %285 = arith.negf %284 : vector<8x2xf32>
    %286 = math.exp %285 : vector<8x2xf32>
    %cst_25 = arith.constant 1.000000e+00 : f32
    %287 = vector.broadcast %cst_25 : f32 to vector<8x2xf32>
    %288 = arith.addf %287, %286 : vector<8x2xf32>
    %289 = arith.divf %287, %288 : vector<8x2xf32>
    %290 = vector.extract_strided_slice %289 {offsets = [0, 0], sizes = [2, 2], strides = [1, 1]} : vector<8x2xf32> to vector<2x2xf32>
    %291 = vector.extract_strided_slice %289 {offsets = [2, 0], sizes = [2, 2], strides = [1, 1]} : vector<8x2xf32> to vector<2x2xf32>
    %292 = vector.extract_strided_slice %289 {offsets = [4, 0], sizes = [2, 2], strides = [1, 1]} : vector<8x2xf32> to vector<2x2xf32>
    %cst_26 = arith.constant 2.000000e+00 : f32
    %293 = vector.broadcast %cst_26 : f32 to vector<2x2xf32>
    %294 = arith.mulf %293, %292 : vector<2x2xf32>
    %cst_27 = arith.constant 1.000000e+00 : f32
    %295 = vector.broadcast %cst_27 : f32 to vector<2x2xf32>
    %296 = arith.subf %294, %295 : vector<2x2xf32>
    %297 = vector.extract_strided_slice %289 {offsets = [6, 0], sizes = [2, 2], strides = [1, 1]} : vector<8x2xf32> to vector<2x2xf32>
    %298 = arith.mulf %291, %272 : vector<2x2xf32>
    %299 = arith.mulf %290, %296 : vector<2x2xf32>
    %300 = arith.addf %298, %299 : vector<2x2xf32>
    %301 = math.tanh %300 : vector<2x2xf32>
    %302 = arith.mulf %297, %301 : vector<2x2xf32>
    %303 = vector.extract_strided_slice %76 {offsets = [8, 0, 0], sizes = [1, 8, 2], strides = [1, 1, 1]} : vector<12x8x2xf32> to vector<1x8x2xf32>
    %304 = vector.shape_cast %303 : vector<1x8x2xf32> to vector<8x2xf32>
    %305 = vector.extract_strided_slice %302 {offsets = [0, 0], sizes = [1, 2], strides = [1, 1]} : vector<2x2xf32> to vector<1x2xf32>
    %306 = vector.broadcast %305 : vector<1x2xf32> to vector<8x2xf32>
    %307 = arith.mulf %50, %306 : vector<8x2xf32>
    %308 = arith.addf %304, %307 : vector<8x2xf32>
    %309 = vector.extract_strided_slice %302 {offsets = [1, 0], sizes = [1, 2], strides = [1, 1]} : vector<2x2xf32> to vector<1x2xf32>
    %310 = vector.broadcast %309 : vector<1x2xf32> to vector<8x2xf32>
    %311 = arith.mulf %67, %310 : vector<8x2xf32>
    %312 = arith.addf %308, %311 : vector<8x2xf32>
    %313 = arith.negf %312 : vector<8x2xf32>
    %314 = math.exp %313 : vector<8x2xf32>
    %cst_28 = arith.constant 1.000000e+00 : f32
    %315 = vector.broadcast %cst_28 : f32 to vector<8x2xf32>
    %316 = arith.addf %315, %314 : vector<8x2xf32>
    %317 = arith.divf %315, %316 : vector<8x2xf32>
    %318 = vector.extract_strided_slice %317 {offsets = [0, 0], sizes = [2, 2], strides = [1, 1]} : vector<8x2xf32> to vector<2x2xf32>
    %319 = vector.extract_strided_slice %317 {offsets = [2, 0], sizes = [2, 2], strides = [1, 1]} : vector<8x2xf32> to vector<2x2xf32>
    %320 = vector.extract_strided_slice %317 {offsets = [4, 0], sizes = [2, 2], strides = [1, 1]} : vector<8x2xf32> to vector<2x2xf32>
    %cst_29 = arith.constant 2.000000e+00 : f32
    %321 = vector.broadcast %cst_29 : f32 to vector<2x2xf32>
    %322 = arith.mulf %321, %320 : vector<2x2xf32>
    %cst_30 = arith.constant 1.000000e+00 : f32
    %323 = vector.broadcast %cst_30 : f32 to vector<2x2xf32>
    %324 = arith.subf %322, %323 : vector<2x2xf32>
    %325 = vector.extract_strided_slice %317 {offsets = [6, 0], sizes = [2, 2], strides = [1, 1]} : vector<8x2xf32> to vector<2x2xf32>
    %326 = arith.mulf %319, %300 : vector<2x2xf32>
    %327 = arith.mulf %318, %324 : vector<2x2xf32>
    %328 = arith.addf %326, %327 : vector<2x2xf32>
    %329 = math.tanh %328 : vector<2x2xf32>
    %330 = arith.mulf %325, %329 : vector<2x2xf32>
    %331 = vector.extract_strided_slice %76 {offsets = [9, 0, 0], sizes = [1, 8, 2], strides = [1, 1, 1]} : vector<12x8x2xf32> to vector<1x8x2xf32>
    %332 = vector.shape_cast %331 : vector<1x8x2xf32> to vector<8x2xf32>
    %333 = vector.extract_strided_slice %330 {offsets = [0, 0], sizes = [1, 2], strides = [1, 1]} : vector<2x2xf32> to vector<1x2xf32>
    %334 = vector.broadcast %333 : vector<1x2xf32> to vector<8x2xf32>
    %335 = arith.mulf %50, %334 : vector<8x2xf32>
    %336 = arith.addf %332, %335 : vector<8x2xf32>
    %337 = vector.extract_strided_slice %330 {offsets = [1, 0], sizes = [1, 2], strides = [1, 1]} : vector<2x2xf32> to vector<1x2xf32>
    %338 = vector.broadcast %337 : vector<1x2xf32> to vector<8x2xf32>
    %339 = arith.mulf %67, %338 : vector<8x2xf32>
    %340 = arith.addf %336, %339 : vector<8x2xf32>
    %341 = arith.negf %340 : vector<8x2xf32>
    %342 = math.exp %341 : vector<8x2xf32>
    %cst_31 = arith.constant 1.000000e+00 : f32
    %343 = vector.broadcast %cst_31 : f32 to vector<8x2xf32>
    %344 = arith.addf %343, %342 : vector<8x2xf32>
    %345 = arith.divf %343, %344 : vector<8x2xf32>
    %346 = vector.extract_strided_slice %345 {offsets = [0, 0], sizes = [2, 2], strides = [1, 1]} : vector<8x2xf32> to vector<2x2xf32>
    %347 = vector.extract_strided_slice %345 {offsets = [2, 0], sizes = [2, 2], strides = [1, 1]} : vector<8x2xf32> to vector<2x2xf32>
    %348 = vector.extract_strided_slice %345 {offsets = [4, 0], sizes = [2, 2], strides = [1, 1]} : vector<8x2xf32> to vector<2x2xf32>
    %cst_32 = arith.constant 2.000000e+00 : f32
    %349 = vector.broadcast %cst_32 : f32 to vector<2x2xf32>
    %350 = arith.mulf %349, %348 : vector<2x2xf32>
    %cst_33 = arith.constant 1.000000e+00 : f32
    %351 = vector.broadcast %cst_33 : f32 to vector<2x2xf32>
    %352 = arith.subf %350, %351 : vector<2x2xf32>
    %353 = vector.extract_strided_slice %345 {offsets = [6, 0], sizes = [2, 2], strides = [1, 1]} : vector<8x2xf32> to vector<2x2xf32>
    %354 = arith.mulf %347, %328 : vector<2x2xf32>
    %355 = arith.mulf %346, %352 : vector<2x2xf32>
    %356 = arith.addf %354, %355 : vector<2x2xf32>
    %357 = math.tanh %356 : vector<2x2xf32>
    %358 = arith.mulf %353, %357 : vector<2x2xf32>
    %359 = vector.extract_strided_slice %76 {offsets = [10, 0, 0], sizes = [1, 8, 2], strides = [1, 1, 1]} : vector<12x8x2xf32> to vector<1x8x2xf32>
    %360 = vector.shape_cast %359 : vector<1x8x2xf32> to vector<8x2xf32>
    %361 = vector.extract_strided_slice %358 {offsets = [0, 0], sizes = [1, 2], strides = [1, 1]} : vector<2x2xf32> to vector<1x2xf32>
    %362 = vector.broadcast %361 : vector<1x2xf32> to vector<8x2xf32>
    %363 = arith.mulf %50, %362 : vector<8x2xf32>
    %364 = arith.addf %360, %363 : vector<8x2xf32>
    %365 = vector.extract_strided_slice %358 {offsets = [1, 0], sizes = [1, 2], strides = [1, 1]} : vector<2x2xf32> to vector<1x2xf32>
    %366 = vector.broadcast %365 : vector<1x2xf32> to vector<8x2xf32>
    %367 = arith.mulf %67, %366 : vector<8x2xf32>
    %368 = arith.addf %364, %367 : vector<8x2xf32>
    %369 = arith.negf %368 : vector<8x2xf32>
    %370 = math.exp %369 : vector<8x2xf32>
    %cst_34 = arith.constant 1.000000e+00 : f32
    %371 = vector.broadcast %cst_34 : f32 to vector<8x2xf32>
    %372 = arith.addf %371, %370 : vector<8x2xf32>
    %373 = arith.divf %371, %372 : vector<8x2xf32>
    %374 = vector.extract_strided_slice %373 {offsets = [0, 0], sizes = [2, 2], strides = [1, 1]} : vector<8x2xf32> to vector<2x2xf32>
    %375 = vector.extract_strided_slice %373 {offsets = [2, 0], sizes = [2, 2], strides = [1, 1]} : vector<8x2xf32> to vector<2x2xf32>
    %376 = vector.extract_strided_slice %373 {offsets = [4, 0], sizes = [2, 2], strides = [1, 1]} : vector<8x2xf32> to vector<2x2xf32>
    %cst_35 = arith.constant 2.000000e+00 : f32
    %377 = vector.broadcast %cst_35 : f32 to vector<2x2xf32>
    %378 = arith.mulf %377, %376 : vector<2x2xf32>
    %cst_36 = arith.constant 1.000000e+00 : f32
    %379 = vector.broadcast %cst_36 : f32 to vector<2x2xf32>
    %380 = arith.subf %378, %379 : vector<2x2xf32>
    %381 = vector.extract_strided_slice %373 {offsets = [6, 0], sizes = [2, 2], strides = [1, 1]} : vector<8x2xf32> to vector<2x2xf32>
    %382 = arith.mulf %375, %356 : vector<2x2xf32>
    %383 = arith.mulf %374, %380 : vector<2x2xf32>
    %384 = arith.addf %382, %383 : vector<2x2xf32>
    %385 = math.tanh %384 : vector<2x2xf32>
    %386 = arith.mulf %381, %385 : vector<2x2xf32>
    %387 = vector.extract_strided_slice %76 {offsets = [11, 0, 0], sizes = [1, 8, 2], strides = [1, 1, 1]} : vector<12x8x2xf32> to vector<1x8x2xf32>
    %388 = vector.shape_cast %387 : vector<1x8x2xf32> to vector<8x2xf32>
    %389 = vector.extract_strided_slice %386 {offsets = [0, 0], sizes = [1, 2], strides = [1, 1]} : vector<2x2xf32> to vector<1x2xf32>
    %390 = vector.broadcast %389 : vector<1x2xf32> to vector<8x2xf32>
    %391 = arith.mulf %50, %390 : vector<8x2xf32>
    %392 = arith.addf %388, %391 : vector<8x2xf32>
    %393 = vector.extract_strided_slice %386 {offsets = [1, 0], sizes = [1, 2], strides = [1, 1]} : vector<2x2xf32> to vector<1x2xf32>
    %394 = vector.broadcast %393 : vector<1x2xf32> to vector<8x2xf32>
    %395 = arith.mulf %67, %394 : vector<8x2xf32>
    %396 = arith.addf %392, %395 : vector<8x2xf32>
    %397 = arith.negf %396 : vector<8x2xf32>
    %398 = math.exp %397 : vector<8x2xf32>
    %cst_37 = arith.constant 1.000000e+00 : f32
    %399 = vector.broadcast %cst_37 : f32 to vector<8x2xf32>
    %400 = arith.addf %399, %398 : vector<8x2xf32>
    %401 = arith.divf %399, %400 : vector<8x2xf32>
    %402 = vector.extract_strided_slice %401 {offsets = [0, 0], sizes = [2, 2], strides = [1, 1]} : vector<8x2xf32> to vector<2x2xf32>
    %403 = vector.extract_strided_slice %401 {offsets = [2, 0], sizes = [2, 2], strides = [1, 1]} : vector<8x2xf32> to vector<2x2xf32>
    %404 = vector.extract_strided_slice %401 {offsets = [4, 0], sizes = [2, 2], strides = [1, 1]} : vector<8x2xf32> to vector<2x2xf32>
    %cst_38 = arith.constant 2.000000e+00 : f32
    %405 = vector.broadcast %cst_38 : f32 to vector<2x2xf32>
    %406 = arith.mulf %405, %404 : vector<2x2xf32>
    %cst_39 = arith.constant 1.000000e+00 : f32
    %407 = vector.broadcast %cst_39 : f32 to vector<2x2xf32>
    %408 = arith.subf %406, %407 : vector<2x2xf32>
    %409 = vector.extract_strided_slice %401 {offsets = [6, 0], sizes = [2, 2], strides = [1, 1]} : vector<8x2xf32> to vector<2x2xf32>
    %410 = arith.mulf %403, %384 : vector<2x2xf32>
    %411 = arith.mulf %402, %408 : vector<2x2xf32>
    %412 = arith.addf %410, %411 : vector<2x2xf32>
    %413 = math.tanh %412 : vector<2x2xf32>
    %414 = arith.mulf %409, %413 : vector<2x2xf32>
    %c34 = arith.constant 34 : index
    %415 = memref.load %arg1[%c34] : memref<35xf32, #tpu.memory_space<smem>>
    %416 = vector.broadcast %415 : f32 to vector<1x2xf32>
    %c32 = arith.constant 32 : index
    %417 = memref.load %arg1[%c32] : memref<35xf32, #tpu.memory_space<smem>>
    %418 = vector.extract_strided_slice %414 {offsets = [0, 0], sizes = [1, 2], strides = [1, 1]} : vector<2x2xf32> to vector<1x2xf32>
    %419 = vector.broadcast %417 : f32 to vector<1x2xf32>
    %420 = arith.mulf %419, %418 : vector<1x2xf32>
    %421 = arith.addf %416, %420 : vector<1x2xf32>
    %c33 = arith.constant 33 : index
    %422 = memref.load %arg1[%c33] : memref<35xf32, #tpu.memory_space<smem>>
    %423 = vector.extract_strided_slice %414 {offsets = [1, 0], sizes = [1, 2], strides = [1, 1]} : vector<2x2xf32> to vector<1x2xf32>
    %424 = vector.broadcast %422 : f32 to vector<1x2xf32>
    %425 = arith.mulf %424, %423 : vector<1x2xf32>
    %426 = arith.addf %421, %425 : vector<1x2xf32>
    %c0_40 = arith.constant 0 : index
    %c0_41 = arith.constant 0 : index
    %427 = vector.load %arg2[%c0_40, %c0_41] : memref<1x2xf32, #tpu.memory_space<vmem>>, vector<1x2xf32>
    tpu.vector_store %arg2[%c0_40, %c0_41], %426 {strides = array<i32>} : memref<1x2xf32, #tpu.memory_space<vmem>>, vector<1x2xf32>,
    return
  }
}

</mosaic_0001>

<bundles_post_ra>
// kernel: _lstm_forward_impl.1
= control target key start
LH: loop header
LB: loop body
LE: loop exit
PB: predicated region body
PF: predicated region fallthrough
CT: control target
= control target key end

     0   :  { %7 = vsyncpa [#allocation4], 0  ;;  %s1075_s0 = inlined_call_operand.vmem [shape: f32[12,1,2], index: 0, kind: input, shape index: {}]   ;;  %s1076_s1 = inlined_call_operand.vmem [shape: f32[35], index: 1, kind: input, shape index: {}]   ;;  %s1077_s2 = inlined_call_operand.hbm [shape: f32[1,2], index: 2, kind: output, shape index: {}]  }
   0x1   :  { %8 = vsyncpa [#allocation3], 0  ;;  %s17_s11 = sshll.u32 %s1076_s1, 4  ;;  %s18_s11 = int_to_ptr.vmem [resolvable:$true] %s17_s11 }
   0x2   :  { %s806_s12 = scalar_lea.vmem %s18_s11, 16  ;;  %p811_p1 = scmp.lt.s32.totalorder %s18_s11, %s18_s11 }
   0x3   :  { %p807_p0 = scmp.ne.s32.totalorder %s18_s11, %s806_s12  ;;  %p812_p2 = scmp.lt.s32.totalorder %s806_s12, %s806_s12 }
   0x5   :  { %p813_p3 = por %p812_p2, %p811_p1 }
   0x7   :  { %p814_p4 = pnand %p813_p3, %p807_p0 }
   0x9   :  { %817 = shalt.err (!%p814_p4)
}
   0xa   :  { %s842_s13 = smov [#allocation2]  }
   0xb   :  { %20 = dma.vmem_to_smem %s18_s11, 16, %s842_s13, [#allocation4]  }
   0xc   :  { %838 = dma.done.wait [#allocation4], 16  }
   0xd   :  { %839 = vsyncadd [#allocation4], 4294967280 }
   0xe   :  { %24 = sfence }
   0xf   :  { %s662_s14 = sld [smem:[#allocation2 + $0x18]]  ;;  %vm41_vm0 = vcmask 1040384   ;;  %vm43_vm1 = vcmask 1041408   ;;  %vm45_vm2 = vcmask 1042432   ;;  %vm47_vm3 = vcmask 1043456  }
  0x10   :  { %s663_s15 = sld [smem:[#allocation2 + $0x19]]  ;;  %vm49_vm4 = vcmask 1044480   ;;  %vm51_vm5 = vcmask 1045504   ;;  %vm53_vm6 = vcmask 1046528   ;;  %v693_v24 = vld [vmem:[%s1075_s0] ss:$0 sm:$0xff] }
  0x11   :  { %s664_s16 = sld [smem:[#allocation2 + $0x1a]]  ;;  %v694_v27 = vld [vmem:[%s1075_s0 + $0x1] ss:$0 sm:$0xff]  ;;  %v695_v28 = vld [vmem:[%s1075_s0 + $0x2] ss:$0 sm:$0xff]  ;;  %vm645_vm7 = vcmask 14342  }
  0x12   :  { %s665_s17 = sld [smem:[#allocation2 + $0x1b]]  ;;  %v696_v31 = vld [vmem:[%s1075_s0 + $0x3] ss:$0 sm:$0xff]  ;;  %v697_v32 = vld [vmem:[%s1075_s0 + $0x4] ss:$0 sm:$0xff] }
  0x13   :  { %s666_s18 = sld [smem:[#allocation2 + $0x1c]]  ;;  %v698_v36 = vld [vmem:[%s1075_s0 + $0x5] ss:$0 sm:$0xff]  ;;  %v699_v37 = vld [vmem:[%s1075_s0 + $0x6] ss:$0 sm:$0xff] }
  0x14   :  { %s667_s19 = sld [smem:[#allocation2 + $0x1d]]  ;;  %v700_v39 = vld [vmem:[%s1075_s0 + $0x7] ss:$0 sm:$0xff]  ;;  %v701_v40 = vld [vmem:[%s1075_s0 + $0x8] ss:$0 sm:$0xff] }
  0x15   :  { %v26_v0 = vstv %s662_s14  ;;  %s862_s1 = sld [smem:[#allocation2 + $0x1e]]  ;;  %v702_v46 = vld [vmem:[%s1075_s0 + $0x9] ss:$0 sm:$0xff]  ;;  %v703_v47 = vld [vmem:[%s1075_s0 + $0xa] ss:$0 sm:$0xff]  ;;  %s843_s14 = smov [#allocation5]  }
  0x16   :  { %v28_v1 = vstv %s663_s15  ;;  %s864_s20 = sld [smem:[#allocation2 + $0x1f]]  ;;  %v704_v52 = vld [vmem:[%s1075_s0 + $0xb] ss:$0 sm:$0xff]  ;;  %s653_s15 = sshll.u32 %s843_s14, 4  ;;  %s654_s15 = int_to_ptr.vmem [resolvable:$true] %s653_s15 }
  0x17   :  { %v30_v2 = vstv %s664_s16  ;;  %v42_v3 = vsel %vm41_vm0, %v26_v0, %v28_v1  ;;  %s55_s21 = sld [smem:[#allocation2]]  ;;  %s818_s16 = scalar_lea.vmem %s654_s15, 16 }
  0x18   :  { %v32_v4 = vstv %s665_s17  ;;  %v44_v5 = vsel %vm43_vm1, %v42_v3, %v30_v2  ;;  %s670_s22 = sld [smem:[#allocation2 + $0x1]]  ;;  %p819_p5 = scmp.ne.s32.totalorder %s654_s15, %s818_s16 }
  0x19   :  { %v34_v6 = vstv %s666_s18  ;;  %v46_v7 = vsel %vm45_vm2, %v44_v5, %v32_v4  ;;  %s671_s23 = sld [smem:[#allocation2 + $0x2]]  ;;  %p823_p6 = scmp.lt.s32.totalorder %s654_s15, %s654_s15 }
  0x1a   :  { %s672_s24 = sld [smem:[#allocation2 + $0x3]]  ;;  %v36_v8 = vstv %s667_s19  ;;  %v48_v9 = vsel %vm47_vm3, %v46_v7, %v34_v6 }
  0x1b   :  { %s673_s25 = sld [smem:[#allocation2 + $0x4]]  ;;  %v38_v12 = vstv %s862_s1  ;;  %v50_v13 = vsel %vm49_vm4, %v48_v9, %v36_v8 }
  0x1c   :  { %s674_s26 = sld [smem:[#allocation2 + $0x5]]  ;;  %v40_v20 = vstv %s864_s20  ;;  %v52_v21 = vsel %vm51_vm5, %v50_v13, %v38_v12 }
  0x1d   :  { %v56_v10 = vstv %s55_s21  ;;  %s675_s27 = sld [smem:[#allocation2 + $0x6]]  ;;  %v911_v33 = vsel %vm53_vm6, %v52_v21, %v40_v20 }
  0x1e   :  { %v58_v11 = vstv %s670_s22  ;;  %s870_s28 = sld [smem:[#allocation2 + $0x7]] }
  0x1f   :  { %v60_v14 = vstv %s671_s23  ;;  %v71_v15 = vsel %vm41_vm0, %v56_v10, %v58_v11  ;;  %s875_s29 = sld [smem:[#allocation2 + $0x8]] }
  0x20   :  { %v62_v16 = vstv %s672_s24  ;;  %v72_v17 = vsel %vm43_vm1, %v71_v15, %v60_v14  ;;  %s878_s30 = sld [smem:[#allocation2 + $0x9]] }
  0x21   :  { %v64_v18 = vstv %s673_s25  ;;  %v73_v19 = vsel %vm45_vm2, %v72_v17, %v62_v16  ;;  %s881_s3 = sld [smem:[#allocation2 + $0xa]] }
  0x22   :  { %v66_v22 = vstv %s674_s26  ;;  %v74_v23 = vsel %vm47_vm3, %v73_v19, %v64_v18  ;;  %s886_s4 = sld [smem:[#allocation2 + $0xb]] }
  0x23   :  { %v68_v25 = vstv %s675_s27  ;;  %v75_v26 = vsel %vm49_vm4, %v74_v23, %v66_v22  ;;  %s892_s7 = sld [smem:[#allocation2 + $0xc]] }
  0x24   :  { %v70_v29 = vstv %s870_s28  ;;  %v76_v30 = vsel %vm51_vm5, %v75_v26, %v68_v25  ;;  %s902_s12 = sld [smem:[#allocation2 + $0xd]] }
  0x25   :  { %v77_v34 = vsel %vm53_vm6, %v76_v30, %v70_v29  ;;  %v79_v35 = vstv %s875_s29  ;;  %s915_s17 = sld [smem:[#allocation2 + $0xe]] }
  0x26   :  { %v81_v38 = vstv %s878_s30  ;;  %s924_s21 = sld [smem:[#allocation2 + $0xf]]  ;;  %v208_v41 = vmul.f32 %v693_v24, %v77_v34  ;;  %v209_v42 = vmul.f32 %v694_v27, %v77_v34  ;;  %v210_v43 = vmul.f32 %v695_v28, %v77_v34 }
  0x27   :  { %v83_v44 = vstv %s881_s3  ;;  %v94_v45 = vsel %vm41_vm0, %v79_v35, %v81_v38  ;;  %s934_s26 = sld [smem:[#allocation2 + $0x10]]  ;;  %v211_v48 = vmul.f32 %v696_v31, %v77_v34  ;;  %v212_v49 = vmul.f32 %v697_v32, %v77_v34 }
  0x28   :  { %v85_v50 = vstv %s886_s4  ;;  %v95_v51 = vsel %vm43_vm1, %v94_v45, %v83_v44  ;;  %s944_s3 = sld [smem:[#allocation2 + $0x11]]  ;;  %v213_v53 = vmul.f32 %v698_v36, %v77_v34  ;;  %v214_v54 = vmul.f32 %v699_v37, %v77_v34 }
  0x29   :  { %v87_v55 = vstv %s892_s7  ;;  %v96_v56 = vsel %vm45_vm2, %v95_v51, %v85_v50  ;;  %s951_s8 = sld [smem:[#allocation2 + $0x12]]  ;;  %v215_v57 = vmul.f32 %v700_v39, %v77_v34  ;;  %v216_v58 = vmul.f32 %v701_v40, %v77_v34 }
  0x2a   :  { %v89_v59 = vstv %s902_s12  ;;  %v97_v60 = vsel %vm47_vm3, %v96_v56, %v87_v55  ;;  %s955_s4 = sld [smem:[#allocation2 + $0x13]]  ;;  %v217_v61 = vmul.f32 %v702_v46, %v77_v34  ;;  %v218_v62 = vmul.f32 %v703_v47, %v77_v34 }
  0x2b   :  { %v91_v63 = vstv %s915_s17  ;;  %v98_v0 = vsel %vm49_vm4, %v97_v60, %v89_v59  ;;  %s959_s0 = sld [smem:[#allocation2 + $0x14]]  ;;  %v219_v1 = vmul.f32 %v704_v52, %v77_v34  ;;  %v220_v2 = vadd.f32 %v208_v41, %v911_v33  ;;  %s822_s17 = scalar_lea.vmem %s654_s15, 32 }
  0x2c   :  { %v93_v3 = vstv %s924_s21  ;;  %v99_v4 = vsel %vm51_vm5, %v98_v0, %v91_v63  ;;  %s690_s7 = sld [smem:[#allocation2 + $0x15]]  ;;  %v221_v5 = vadd.f32 %v209_v42, %v911_v33  ;;  %v966_v6 = vadd.f32 %v210_v43, %v911_v33  ;;  %p824_p7 = scmp.lt.s32.totalorder %s822_s17, %s818_s16 }
  0x2d   :  { %v969_v7 = vsel %vm53_vm6, %v99_v4, %v93_v3  ;;  %v102_v8 = vstv %s934_s26  ;;  %s691_s9 = sld [smem:[#allocation2 + $0x16]]  ;;  %v973_v9 = vadd.f32 %v211_v48, %v911_v33  ;;  %v976_v10 = vadd.f32 %v212_v49, %v911_v33 }
  0x2e   :  { %v104_v11 = vstv %s944_s3  ;;  %s692_s10 = sld [smem:[#allocation2 + $0x17]]  ;;  %v980_v12 = vadd.f32 %v213_v53, %v911_v33  ;;  %v983_v13 = vadd.f32 %v214_v54, %v911_v33  ;;  %v986_v14 = vadd.f32 %v215_v57, %v911_v33  ;;  %p825_p8 = por %p824_p7, %p823_p6 }
  0x2f   :  { %v106_v15 = vstv %s951_s8  ;;  %v117_v16 = vsel %vm41_vm0, %v102_v8, %v104_v11  ;;  %v991_v17 = vadd.f32 %v216_v58, %v911_v33  ;;  %v994_v18 = vadd.f32 %v217_v61, %v911_v33  ;;  %s730_s11 = sld [smem:[#allocation2 + $0x20]] }
  0x30   :  { %v108_v19 = vstv %s955_s4  ;;  %v118_v20 = vsel %vm43_vm1, %v117_v16, %v106_v15  ;;  %v999_v21 = vadd.f32 %v218_v62, %v911_v33  ;;  %v1002_v22 = vadd.f32 %v219_v1, %v911_v33  ;;  %s731_s12 = sld [smem:[#allocation2 + $0x21]]  ;;  %p826_p9 = pnand %p825_p8, %p819_p5 }
  0x31   :  { %v110_v23 = vstv %s959_s0  ;;  %v119_v24 = vsel %vm45_vm2, %v118_v20, %v108_v19  ;;  %v232_v25 = vmul.f32 0.0, %v969_v7  ;;  %v258_v47 = vlaneseq  ;;  %s729_s13 = sld [smem:[#allocation2 + $0x22]] }
  0x32   :  { %v112_v26 = vstv %s690_s7  ;;  %v120_v27 = vsel %vm47_vm3, %v119_v24, %v110_v23 }
  0x33   :  { %v114_v28 = vstv %s691_s9  ;;  %v121_v29 = vsel %vm49_vm4, %v120_v27, %v112_v26  ;;  %v233_v32 = vadd.f32 %v232_v25, %v220_v2  ;;  %v259_v48 = vshrl.u32 %v258_v47, 7 }
  0x34   :  { %v116_v30 = vstv %s692_s10  ;;  %v122_v31 = vsel %vm51_vm5, %v121_v29, %v114_v28 }
  0x35   :  { %v1011_v34 = vsel %vm53_vm6, %v122_v31, %v116_v30  ;;  %v1014_v51 = vsub.s32 6, %v259_v48  ;;  %v1016_v52 = vsub.s32 7, %v259_v48 }
  0x36   :  { %v234_v33 = vmul.f32 0.0, %v1011_v34 }
  0x38   :  { %v235_v35 = vadd.f32 %v234_v33, %v233_v32 }
  0x3a   :  { %v705_v36 = vmul.f32 -1.442695, %v235_v35 }
  0x3c   :  { %734 = vpow2.f32 %v705_v36 }
  0x49   :  { %v735_v37 = vpop.eup %734 }
  0x4a   :  { %v239_v38 = vadd.f32 1.0, %v735_v37 }
  0x4c   :  { %736 = vrcp.f32 %v239_v38 }
  0x59   :  { %v737_v39 = vpop.eup %736 }
  0x5a   :  { %v242_v40 = vmul.f32 2.0, %v737_v39  ;;  %v244_v43 = vmul.f32 0.0, %v737_v39 }
  0x5c   :  { %v706_v41 = vadd.f32 -1.0, %v242_v40 }
  0x5e   :  { %v246_v42 = vrot.slane %v706_v41, 4 }
  0x60   :  { %v248_v44 = vmul.f32 %v737_v39, %v246_v42 }
  0x62   :  { %v250_v45 = vrot.slane %v248_v44, 6 }
  0x64   :  { %v252_v46 = vadd.f32 %v250_v45, %v244_v43 }
  0x66   :  { %738 = vtanh.f32 %v252_v46 }
  0x73   :  { %v739_v49 = vpop.eup %738 }
  0x74   :  { %v255_v50 = vrot.slane %v739_v49, 4 }
  0x76   :  { %v257_v53 = vmul.f32 %v737_v39, %v255_v50 }
  0x78   :  { %v261_v54 = vrot.slane %v257_v53, %v1014_v51  ;;  %v267_v55 = vrot.slane %v257_v53, %v1016_v52 }
  0x7a   :  { %v262_v56 = vmul.f32 %v261_v54, %v969_v7  ;;  %v268_v57 = vmul.f32 %v267_v55, %v1011_v34 }
  0x7c   :  { %v263_v58 = vadd.f32 %v262_v56, %v221_v5 }
  0x7e   :  { %v269_v59 = vadd.f32 %v268_v57, %v263_v58 }
  0x80   :  { %v707_v60 = vmul.f32 -1.442695, %v269_v59 }
  0x82   :  { %740 = vpow2.f32 %v707_v60 }
  0x8f   :  { %v741_v61 = vpop.eup %740 }
  0x90   :  { %v273_v62 = vadd.f32 1.0, %v741_v61 }
  0x92   :  { %742 = vrcp.f32 %v273_v62 }
  0x9f   :  { %v743_v63 = vpop.eup %742 }
  0xa0   :  { %v276_v0 = vmul.f32 2.0, %v743_v63  ;;  %v278_v1 = vmul.f32 %v743_v63, %v252_v46 }
  0xa2   :  { %v708_v2 = vadd.f32 -1.0, %v276_v0 }
  0xa4   :  { %v280_v3 = vrot.slane %v708_v2, 4 }
  0xa6   :  { %v282_v4 = vmul.f32 %v743_v63, %v280_v3 }
  0xa8   :  { %v284_v8 = vrot.slane %v282_v4, 6 }
  0xaa   :  { %v286_v11 = vadd.f32 %v284_v8, %v278_v1 }
  0xac   :  { %744 = vtanh.f32 %v286_v11 }
  0xb9   :  { %v745_v15 = vpop.eup %744 }
  0xba   :  { %v289_v16 = vrot.slane %v745_v15, 4 }
  0xbc   :  { %v291_v19 = vmul.f32 %v743_v63, %v289_v16 }
  0xbe   :  { %v295_v5 = vrot.slane %v291_v19, %v1014_v51  ;;  %v301_v20 = vrot.slane %v291_v19, %v1016_v52 }
  0xc0   :  { %v296_v23 = vmul.f32 %v295_v5, %v969_v7  ;;  %v302_v24 = vmul.f32 %v301_v20, %v1011_v34 }
  0xc2   :  { %v297_v25 = vadd.f32 %v296_v23, %v966_v6 }
  0xc4   :  { %v303_v26 = vadd.f32 %v302_v24, %v297_v25 }
  0xc6   :  { %v709_v27 = vmul.f32 -1.442695, %v303_v26 }
  0xc8   :  { %746 = vpow2.f32 %v709_v27 }
  0xd5   :  { %v747_v28 = vpop.eup %746 }
  0xd6   :  { %v307_v29 = vadd.f32 1.0, %v747_v28 }
  0xd8   :  { %748 = vrcp.f32 %v307_v29 }
  0xe5   :  { %v749_v30 = vpop.eup %748 }
  0xe6   :  { %v310_v31 = vmul.f32 2.0, %v749_v30  ;;  %v312_v32 = vmul.f32 %v749_v30, %v286_v11 }
  0xe8   :  { %v710_v33 = vadd.f32 -1.0, %v310_v31 }
  0xea   :  { %v314_v35 = vrot.slane %v710_v33, 4 }
  0xec   :  { %v316_v36 = vmul.f32 %v749_v30, %v314_v35 }
  0xee   :  { %v318_v37 = vrot.slane %v316_v36, 6 }
  0xf0   :  { %v320_v38 = vadd.f32 %v318_v37, %v312_v32 }
  0xf2   :  { %750 = vtanh.f32 %v320_v38 }
  0xff   :  { %v751_v39 = vpop.eup %750 }
 0x100   :  { %v323_v40 = vrot.slane %v751_v39, 4 }
 0x102   :  { %v325_v41 = vmul.f32 %v749_v30, %v323_v40 }
 0x104   :  { %v329_v6 = vrot.slane %v325_v41, %v1014_v51  ;;  %v335_v42 = vrot.slane %v325_v41, %v1016_v52 }
 0x106   :  { %v330_v43 = vmul.f32 %v329_v6, %v969_v7  ;;  %v336_v44 = vmul.f32 %v335_v42, %v1011_v34 }
 0x108   :  { %v331_v45 = vadd.f32 %v330_v43, %v973_v9 }
 0x10a   :  { %v337_v46 = vadd.f32 %v336_v44, %v331_v45 }
 0x10c   :  { %v711_v47 = vmul.f32 -1.442695, %v337_v46 }
 0x10e   :  { %752 = vpow2.f32 %v711_v47 }
 0x11b   :  { %v753_v48 = vpop.eup %752 }
 0x11c   :  { %v341_v49 = vadd.f32 1.0, %v753_v48 }
 0x11e   :  { %754 = vrcp.f32 %v341_v49 }
 0x12b   :  { %v755_v50 = vpop.eup %754 }
 0x12c   :  { %v344_v53 = vmul.f32 2.0, %v755_v50  ;;  %v346_v54 = vmul.f32 %v755_v50, %v320_v38 }
 0x12e   :  { %v712_v55 = vadd.f32 -1.0, %v344_v53 }
 0x130   :  { %v348_v56 = vrot.slane %v712_v55, 4 }
 0x132   :  { %v350_v57 = vmul.f32 %v755_v50, %v348_v56 }
 0x134   :  { %v352_v58 = vrot.slane %v350_v57, 6 }
 0x136   :  { %v354_v59 = vadd.f32 %v352_v58, %v346_v54 }
 0x138   :  { %756 = vtanh.f32 %v354_v59 }
 0x145   :  { %v757_v60 = vpop.eup %756 }
 0x146   :  { %v357_v61 = vrot.slane %v757_v60, 4 }
 0x148   :  { %v359_v62 = vmul.f32 %v755_v50, %v357_v61 }
 0x14a   :  { %v363_v9 = vrot.slane %v359_v62, %v1014_v51  ;;  %v369_v63 = vrot.slane %v359_v62, %v1016_v52 }
 0x14c   :  { %v364_v0 = vmul.f32 %v363_v9, %v969_v7  ;;  %v370_v1 = vmul.f32 %v369_v63, %v1011_v34 }
 0x14e   :  { %v365_v2 = vadd.f32 %v364_v0, %v976_v10 }
 0x150   :  { %v371_v3 = vadd.f32 %v370_v1, %v365_v2 }
 0x152   :  { %v713_v4 = vmul.f32 -1.442695, %v371_v3 }
 0x154   :  { %758 = vpow2.f32 %v713_v4 }
 0x161   :  { %v759_v8 = vpop.eup %758 }
 0x162   :  { %v375_v11 = vadd.f32 1.0, %v759_v8 }
 0x164   :  { %760 = vrcp.f32 %v375_v11 }
 0x171   :  { %v761_v15 = vpop.eup %760 }
 0x172   :  { %v378_v16 = vmul.f32 2.0, %v761_v15  ;;  %v380_v19 = vmul.f32 %v761_v15, %v354_v59 }
 0x174   :  { %v714_v5 = vadd.f32 -1.0, %v378_v16 }
 0x176   :  { %v382_v20 = vrot.slane %v714_v5, 4 }
 0x178   :  { %v384_v23 = vmul.f32 %v761_v15, %v382_v20 }
 0x17a   :  { %v386_v24 = vrot.slane %v384_v23, 6 }
 0x17c   :  { %v388_v25 = vadd.f32 %v386_v24, %v380_v19 }
 0x17e   :  { %762 = vtanh.f32 %v388_v25 }
 0x18b   :  { %v763_v26 = vpop.eup %762 }
 0x18c   :  { %v391_v27 = vrot.slane %v763_v26, 4 }
 0x18e   :  { %v393_v28 = vmul.f32 %v761_v15, %v391_v27 }
 0x190   :  { %v397_v10 = vrot.slane %v393_v28, %v1014_v51  ;;  %v403_v29 = vrot.slane %v393_v28, %v1016_v52 }
 0x192   :  { %v398_v30 = vmul.f32 %v397_v10, %v969_v7  ;;  %v404_v31 = vmul.f32 %v403_v29, %v1011_v34 }
 0x194   :  { %v399_v32 = vadd.f32 %v398_v30, %v980_v12 }
 0x196   :  { %v405_v33 = vadd.f32 %v404_v31, %v399_v32 }
 0x198   :  { %v715_v35 = vmul.f32 -1.442695, %v405_v33 }
 0x19a   :  { %764 = vpow2.f32 %v715_v35 }
 0x1a7   :  { %v765_v36 = vpop.eup %764 }
 0x1a8   :  { %v409_v37 = vadd.f32 1.0, %v765_v36 }
 0x1aa   :  { %766 = vrcp.f32 %v409_v37 }
 0x1b7   :  { %v767_v38 = vpop.eup %766 }
 0x1b8   :  { %v412_v39 = vmul.f32 2.0, %v767_v38  ;;  %v414_v40 = vmul.f32 %v767_v38, %v388_v25 }
 0x1ba   :  { %v716_v41 = vadd.f32 -1.0, %v412_v39 }
 0x1bc   :  { %v416_v6 = vrot.slane %v716_v41, 4 }
 0x1be   :  { %v418_v42 = vmul.f32 %v767_v38, %v416_v6 }
 0x1c0   :  { %v420_v43 = vrot.slane %v418_v42, 6 }
 0x1c2   :  { %v422_v44 = vadd.f32 %v420_v43, %v414_v40 }
 0x1c4   :  { %768 = vtanh.f32 %v422_v44 }
 0x1d1   :  { %v769_v45 = vpop.eup %768 }
 0x1d2   :  { %v425_v46 = vrot.slane %v769_v45, 4 }
 0x1d4   :  { %v427_v47 = vmul.f32 %v767_v38, %v425_v46 }
 0x1d6   :  { %v431_v12 = vrot.slane %v427_v47, %v1014_v51  ;;  %v437_v48 = vrot.slane %v427_v47, %v1016_v52 }
 0x1d8   :  { %v432_v49 = vmul.f32 %v431_v12, %v969_v7  ;;  %v438_v50 = vmul.f32 %v437_v48, %v1011_v34 }
 0x1da   :  { %v433_v53 = vadd.f32 %v432_v49, %v983_v13 }
 0x1dc   :  { %v439_v54 = vadd.f32 %v438_v50, %v433_v53 }
 0x1de   :  { %v717_v55 = vmul.f32 -1.442695, %v439_v54 }
 0x1e0   :  { %770 = vpow2.f32 %v717_v55 }
 0x1ed   :  { %v771_v56 = vpop.eup %770 }
 0x1ee   :  { %v443_v57 = vadd.f32 1.0, %v771_v56 }
 0x1f0   :  { %772 = vrcp.f32 %v443_v57 }
 0x1fd   :  { %v773_v58 = vpop.eup %772 }
 0x1fe   :  { %v446_v59 = vmul.f32 2.0, %v773_v58  ;;  %v448_v60 = vmul.f32 %v773_v58, %v422_v44 }
 0x200   :  { %v718_v61 = vadd.f32 -1.0, %v446_v59 }
 0x202   :  { %v450_v62 = vrot.slane %v718_v61, 4 }
 0x204   :  { %v452_v9 = vmul.f32 %v773_v58, %v450_v62 }
 0x206   :  { %v454_v63 = vrot.slane %v452_v9, 6 }
 0x208   :  { %v456_v0 = vadd.f32 %v454_v63, %v448_v60 }
 0x20a   :  { %774 = vtanh.f32 %v456_v0 }
 0x217   :  { %v775_v1 = vpop.eup %774 }
 0x218   :  { %v459_v2 = vrot.slane %v775_v1, 4 }
 0x21a   :  { %v461_v3 = vmul.f32 %v773_v58, %v459_v2 }
 0x21c   :  { %v465_v13 = vrot.slane %v461_v3, %v1014_v51  ;;  %v471_v4 = vrot.slane %v461_v3, %v1016_v52 }
 0x21e   :  { %v466_v8 = vmul.f32 %v465_v13, %v969_v7  ;;  %v472_v11 = vmul.f32 %v471_v4, %v1011_v34 }
 0x220   :  { %v467_v15 = vadd.f32 %v466_v8, %v986_v14 }
 0x222   :  { %v473_v16 = vadd.f32 %v472_v11, %v467_v15 }
 0x224   :  { %v719_v19 = vmul.f32 -1.442695, %v473_v16 }
 0x226   :  { %776 = vpow2.f32 %v719_v19 }
 0x233   :  { %v777_v5 = vpop.eup %776 }
 0x234   :  { %v477_v20 = vadd.f32 1.0, %v777_v5 }
 0x236   :  { %778 = vrcp.f32 %v477_v20 }
 0x243   :  { %v779_v23 = vpop.eup %778 }
 0x244   :  { %v480_v24 = vmul.f32 2.0, %v779_v23  ;;  %v482_v25 = vmul.f32 %v779_v23, %v456_v0 }
 0x246   :  { %v720_v26 = vadd.f32 -1.0, %v480_v24 }
 0x248   :  { %v484_v27 = vrot.slane %v720_v26, 4 }
 0x24a   :  { %v486_v28 = vmul.f32 %v779_v23, %v484_v27 }
 0x24c   :  { %v488_v10 = vrot.slane %v486_v28, 6 }
 0x24e   :  { %v490_v29 = vadd.f32 %v488_v10, %v482_v25 }
 0x250   :  { %780 = vtanh.f32 %v490_v29 }
 0x25d   :  { %v781_v30 = vpop.eup %780 }
 0x25e   :  { %v493_v31 = vrot.slane %v781_v30, 4 }
 0x260   :  { %v495_v32 = vmul.f32 %v779_v23, %v493_v31 }
 0x262   :  { %v499_v14 = vrot.slane %v495_v32, %v1014_v51  ;;  %v505_v33 = vrot.slane %v495_v32, %v1016_v52 }
 0x264   :  { %v500_v35 = vmul.f32 %v499_v14, %v969_v7  ;;  %v506_v36 = vmul.f32 %v505_v33, %v1011_v34 }
 0x266   :  { %v501_v37 = vadd.f32 %v500_v35, %v991_v17 }
 0x268   :  { %v507_v38 = vadd.f32 %v506_v36, %v501_v37 }
 0x26a   :  { %v721_v39 = vmul.f32 -1.442695, %v507_v38 }
 0x26c   :  { %782 = vpow2.f32 %v721_v39 }
 0x279   :  { %v783_v40 = vpop.eup %782 }
 0x27a   :  { %v511_v41 = vadd.f32 1.0, %v783_v40 }
 0x27c   :  { %784 = vrcp.f32 %v511_v41 }
 0x289   :  { %v785_v6 = vpop.eup %784 }
 0x28a   :  { %v514_v42 = vmul.f32 2.0, %v785_v6  ;;  %v516_v43 = vmul.f32 %v785_v6, %v490_v29 }
 0x28c   :  { %v722_v44 = vadd.f32 -1.0, %v514_v42 }
 0x28e   :  { %v518_v45 = vrot.slane %v722_v44, 4 }
 0x290   :  { %v520_v46 = vmul.f32 %v785_v6, %v518_v45 }
 0x292   :  { %v522_v47 = vrot.slane %v520_v46, 6 }
 0x294   :  { %v524_v12 = vadd.f32 %v522_v47, %v516_v43 }
 0x296   :  { %786 = vtanh.f32 %v524_v12 }
 0x2a3   :  { %v787_v48 = vpop.eup %786 }
 0x2a4   :  { %v527_v49 = vrot.slane %v787_v48, 4 }
 0x2a6   :  { %v529_v50 = vmul.f32 %v785_v6, %v527_v49  ;;  %v633_v49 = vstv %s729_s13 }
 0x2a8   :  { %v533_v17 = vrot.slane %v529_v50, %v1014_v51  ;;  %v539_v53 = vrot.slane %v529_v50, %v1016_v52 }
 0x2aa   :  { %v534_v54 = vmul.f32 %v533_v17, %v969_v7  ;;  %v540_v55 = vmul.f32 %v539_v53, %v1011_v34 }
 0x2ac   :  { %v535_v56 = vadd.f32 %v534_v54, %v994_v18 }
 0x2ae   :  { %v541_v57 = vadd.f32 %v540_v55, %v535_v56 }
 0x2b0   :  { %v723_v58 = vmul.f32 -1.442695, %v541_v57 }
 0x2b2   :  { %788 = vpow2.f32 %v723_v58 }
 0x2bf   :  { %v789_v59 = vpop.eup %788 }
 0x2c0   :  { %v545_v60 = vadd.f32 1.0, %v789_v59 }
 0x2c2   :  { %790 = vrcp.f32 %v545_v60 }
 0x2cf   :  { %v791_v61 = vpop.eup %790 }
 0x2d0   :  { %v548_v62 = vmul.f32 2.0, %v791_v61  ;;  %v550_v9 = vmul.f32 %v791_v61, %v524_v12  ;;  %v639_v12 = vstv %s731_s12 }
 0x2d2   :  { %v724_v63 = vadd.f32 -1.0, %v548_v62 }
 0x2d4   :  { %v552_v0 = vrot.slane %v724_v63, 4 }
 0x2d6   :  { %v554_v1 = vmul.f32 %v791_v61, %v552_v0 }
 0x2d8   :  { %v556_v2 = vrot.slane %v554_v1, 6 }
 0x2da   :  { %v558_v3 = vadd.f32 %v556_v2, %v550_v9 }
 0x2dc   :  { %792 = vtanh.f32 %v558_v3 }
 0x2e9   :  { %v793_v13 = vpop.eup %792 }
 0x2ea   :  { %v561_v4 = vrot.slane %v793_v13, 4 }
 0x2ec   :  { %v563_v8 = vmul.f32 %v791_v61, %v561_v4 }
 0x2ee   :  { %v567_v18 = vrot.slane %v563_v8, %v1014_v51  ;;  %v573_v11 = vrot.slane %v563_v8, %v1016_v52 }
 0x2f0   :  { %v568_v15 = vmul.f32 %v567_v18, %v969_v7  ;;  %v574_v16 = vmul.f32 %v573_v11, %v1011_v34 }
 0x2f2   :  { %v569_v19 = vadd.f32 %v568_v15, %v999_v21 }
 0x2f4   :  { %v575_v5 = vadd.f32 %v574_v16, %v569_v19 }
 0x2f6   :  { %v725_v20 = vmul.f32 -1.442695, %v575_v5 }
 0x2f8   :  { %794 = vpow2.f32 %v725_v20 }
 0x305   :  { %v795_v23 = vpop.eup %794 }
 0x306   :  { %v579_v24 = vadd.f32 1.0, %v795_v23 }
 0x308   :  { %796 = vrcp.f32 %v579_v24 }
 0x315   :  { %v797_v25 = vpop.eup %796 }
 0x316   :  { %v582_v26 = vmul.f32 2.0, %v797_v25  ;;  %v584_v27 = vmul.f32 %v797_v25, %v558_v3 }
 0x318   :  { %v726_v28 = vadd.f32 -1.0, %v582_v26 }
 0x31a   :  { %v586_v10 = vrot.slane %v726_v28, 4 }
 0x31c   :  { %v588_v29 = vmul.f32 %v797_v25, %v586_v10 }
 0x31e   :  { %v590_v30 = vrot.slane %v588_v29, 6 }
 0x320   :  { %v592_v31 = vadd.f32 %v590_v30, %v584_v27 }
 0x322   :  { %798 = vtanh.f32 %v592_v31 }
 0x32f   :  { %v799_v32 = vpop.eup %798 }
 0x330   :  { %v595_v14 = vrot.slane %v799_v32, 4 }
 0x332   :  { %v597_v33 = vmul.f32 %v797_v25, %v595_v14 }
 0x334   :  { %v601_v21 = vrot.slane %v597_v33, %v1014_v51  ;;  %v607_v35 = vrot.slane %v597_v33, %v1016_v52 }
 0x336   :  { %v602_v36 = vmul.f32 %v601_v21, %v969_v7  ;;  %v608_v37 = vmul.f32 %v607_v35, %v1011_v34  ;;  %v635_v34 = vstv %s730_s11 }
 0x338   :  { %v603_v38 = vadd.f32 %v602_v36, %v1002_v22 }
 0x33a   :  { %v609_v39 = vadd.f32 %v608_v37, %v603_v38 }
 0x33c   :  { %v727_v40 = vmul.f32 -1.442695, %v609_v39 }
 0x33e   :  { %800 = vpow2.f32 %v727_v40 }
 0x34b   :  { %v801_v41 = vpop.eup %800 }
 0x34c   :  { %v613_v6 = vadd.f32 1.0, %v801_v41 }
 0x34e   :  { %802 = vrcp.f32 %v613_v6 }
 0x35b   :  { %v803_v42 = vpop.eup %802 }
 0x35c   :  { %v616_v43 = vmul.f32 2.0, %v803_v42  ;;  %v618_v44 = vmul.f32 %v803_v42, %v592_v31 }
 0x35e   :  { %v728_v45 = vadd.f32 -1.0, %v616_v43 }
 0x360   :  { %v620_v46 = vrot.slane %v728_v45, 4 }
 0x362   :  { %v622_v51 = vmul.f32 %v803_v42, %v620_v46 }
 0x364   :  { %v624_v47 = vrot.slane %v622_v51, 6 }
 0x366   :  { %v626_v52 = vadd.f32 %v624_v47, %v618_v44 }
 0x368   :  { %804 = vtanh.f32 %v626_v52 }
 0x375   :  { %v805_v7 = vpop.eup %804 }
 0x376   :  { %v629_v22 = vrot.slane %v805_v7, 4 }
 0x378   :  { %v631_v48 = vmul.f32 %v803_v42, %v629_v22 }
 0x37a   :  { %v636_v50 = vmul.f32 %v635_v34, %v631_v48  ;;  %v640_v17 = vmul.f32 %v639_v12, %v631_v48 }
 0x37c   :  { %v637_v53 = vadd.f32 %v636_v50, %v633_v49  ;;  %v642_v54 = vrot.slane %v640_v17, 1 }
 0x37e   :  { %v644_v55 = vadd.f32 %v642_v54, %v637_v53 }
 0x380   :  { %646 = vst.msk [vmem:[#allocation5 - $0x6] sm:$0x40] %vm645_vm7, %v644_v55 }
 0x381   :  { %829 = shalt.err (!%p826_p9)
}
 0x382   :  { %656 = dma.vmem_to_hbm [thread:$0]  %s654_s15, 16, %s1077_s2, [#allocation3]  }
 0x383   :  { %840 = dma.done.wait [#allocation3], 16  }
 0x384   :  { %841 = vsyncadd [#allocation3], 4294967280 }
 0x385   :  { %660 = vsyncpa [#allocation3], 1 }
 0x386   :  { %661 = vsyncpa [#allocation4], 1 }

</bundles_post_ra>
